<compile_context>
chip_gen: v5e
topology: v5e:2x2
jax: 0.10.0
libtpu: 0.0.40
codegen_flags: <defaults>
</compile_context>

<pallas_src>
import functools
import math

import jax
import jax.numpy as jnp
from jax.experimental import pallas as pl
from jax.experimental.pallas import tpu as pltpu


# --------------------------------------------------------------------------
# small helpers
# --------------------------------------------------------------------------
def _round_up(x, m):
    return (x + m - 1) // m * m


def _device_kind():
    try:
        return jax.devices()[0].device_kind.lower()
    except Exception:
        return ""


def _tpu_generation():
    kind = _device_kind()
    for g in (7, 6, 5):
        if (f"v{g}" in kind) or (f"{g}x" in kind) or (f"{g}e" in kind):
            return g
    return 6  # safe middle-of-the-road assumption


def _vmem_capacity_bytes():
    """Physical VMEM per TensorCore; never assume more than the device has."""
    try:
        cap = int(pltpu.get_tpu_info().vmem_capacity_bytes)
        if cap > 0:
            return cap
    except Exception:
        pass
    # conservative fallbacks: v7x has 64 MiB/TC, v5e/v6e have 128 MiB.
    return 64 * 2**20 if _tpu_generation() >= 7 else 128 * 2**20


def _gen_defaults(gen):
    """(default token tile, preferred tm multiple, want >=2 token tiles)."""
    if gen >= 7:
        return 512, 256, True    # 64 MiB VMEM/TC, 2 TCs/chip, 256x256 MXU
    if gen == 6:
        return 1024, 256, False  # 128 MiB VMEM, 256x256 MXU
    return 512, 128, False       # v5e: 128 MiB VMEM, 128x128 MXU


def _working_vmem_bytes(tm, tk, n_embd, itemsize):
    """Double-buffered streamed tiles + resident f32 accumulator."""
    return (itemsize * (2 * tm * n_embd          # x tile
                        + 2 * n_embd * 2 * tk    # fused [w1|w2] tile
                        + 2 * tk * n_embd        # w3 tile
                        + 2 * tm * n_embd)       # output tile
            + 4 * tm * n_embd)                   # f32 accumulator


def _pick_hidden_tile(n_hidden, n_embd, itemsize, vmem_cap, target=512):
    """Largest of (target, 512, 256, 128) dividing n_hidden whose weight tiles
    leave room for the rest of the working set; else full n_hidden."""
    cands = []
    for t in (target, 512, 256, 128):
        if t and 0 < t <= n_hidden and n_hidden % t == 0 and t not in cands:
            cands.append(t)
    if not cands:
        return n_hidden
    for t in cands:
        if 6 * t * n_embd * itemsize <= 0.6 * vmem_cap:
            return t
    return cands[-1]


# --------------------------------------------------------------------------
# weight packing (hoisted out of the per-forward hot path)
# --------------------------------------------------------------------------
def prepare_mlp_weights(w1, w2, w3, *, compute_dtype="auto", tk=None):
    """Pack weights ONCE.

    w1/w2: [n_embd, n_hidden], w3: [n_hidden, n_embd] (stored [in, out], i.e.
    transposed vs. torch nn.Linear.weight).  Returns (w12, w3, tk) where w12
    is the tile-interleaved [n_embd, 2*n_hidden] fused gate/up matrix: columns
    [k*2*tk : k*2*tk+tk] hold w1 tile k, the next tk columns hold w2 tile k.
    """
    n_embd, n_hidden = w1.shape
    assert w2.shape == (n_embd, n_hidden)
    assert w3.shape == (n_hidden, n_embd)

    if compute_dtype == "auto":
        # bf16 keeps the MXU at full rate and halves weight DMA on every
        # generation; f32 accumulation and the f32 gate stay inside the kernel.
        compute_dtype = jnp.bfloat16
        # TODO(synk): optional fp8 weight path for v7x (fp8-native MXU).

    itemsize = jnp.dtype(compute_dtype).itemsize
    if tk is None:
        tk = _pick_hidden_tile(n_hidden, n_embd, itemsize, _vmem_capacity_bytes())
    nk = n_hidden // tk

    w1c = jnp.asarray(w1, compute_dtype)
    w2c = jnp.asarray(w2, compute_dtype)
    w3c = jnp.asarray(w3, compute_dtype)
    w12 = jnp.concatenate(
        [w1c.reshape(n_embd, nk, tk), w2c.reshape(n_embd, nk, tk)], axis=2
    ).reshape(n_embd, 2 * n_hidden)
    return w12, w3c, tk


# --------------------------------------------------------------------------
# kernel
# --------------------------------------------------------------------------
def _mlp_kernel(x_ref, w12_ref, w3_ref, o_ref, acc_ref, *, nk):
    # x_ref:   (tm, n_embd)        token tile (resident across k)
    # w12_ref: (n_embd, 2*tk)      [w1_tile_k | w2_tile_k] fused gate/up
    # w3_ref:  (tk, n_embd)        down-projection tile
    # o_ref:   (tm, n_embd)        output tile (written at last k)
    # acc_ref: (tm, n_embd) f32    accumulator across the hidden axis
    k = pl.program_id(1)
    tk = w3_ref.shape[0]

    # Single MXU pass over the fused [w1|w2] tile, f32 accumulation.
    h = jnp.dot(x_ref[...], w12_ref[...], preferred_element_type=jnp.float32)
    h1 = h[:, :tk]
    h2 = h[:, tk:]

    # SwiGLU gate in f32 (EUP sigmoid; avoids pack/unpack churn on v5e).
    gated = (h1 * jax.nn.sigmoid(h1)) * h2

    # Partial down-projection for this hidden tile.
    part = jnp.dot(gated.astype(w3_ref.dtype), w3_ref[...],
                   preferred_element_type=jnp.float32)

    if nk == 1:
        o_ref[...] = part.astype(o_ref.dtype)
    else:
        @pl.when(k == 0)
        def _():                       # fused prologue: no zeros fill
            acc_ref[...] = part

        @pl.when(jnp.logical_and(k > 0, k < nk - 1))
        def _():
            acc_ref[...] += part

        @pl.when(k == nk - 1)
        def _():                       # fused epilogue: no acc re-store
            o_ref[...] = (acc_ref[...] + part).astype(o_ref.dtype)


# --------------------------------------------------------------------------
# pallas_call wrapper
# --------------------------------------------------------------------------
def mlp_pallas(x_tokens, w12, w3, tk, *, tm=None):
    """x_tokens: [M, n_embd]; w12: [n_embd, 2*n_hidden]; w3: [n_hidden, n_embd]."""
    M, n_embd = x_tokens.shape
    n_hidden = w3.shape[0]
    assert w12.shape == (n_embd, 2 * n_hidden)
    assert n_hidden % tk == 0
    nk = n_hidden // tk

    dtype = x_tokens.dtype
    itemsize = jnp.dtype(dtype).itemsize

    gen = _tpu_generation()
    tm_default, pref_mult, want_two_tiles = _gen_defaults(gen)
    granule = 16 if itemsize < 4 else 8           # bf16 min tile is (16, 128)

    cap = _vmem_capacity_bytes()
    budget = int(cap * 0.8)

    # ---- token-tile selection (dtype/MXU aware, VMEM-fit, megacore aware) --
    m_ceil = _round_up(max(M, granule), granule)
    tm_req = tm_default if tm is None else tm
    tm = min(_round_up(max(tm_req, granule), granule), m_ceil)
    if tm >= pref_mult:
        tm = tm // pref_mult * pref_mult          # full MXU passes, no masked stores
    if want_two_tiles and m_ceil >= 2 * granule:  # keep both v7x TCs busy
        tm = min(tm, _round_up((m_ceil + 1) // 2, granule))
    while tm > granule and _working_vmem_bytes(tm, tk, n_embd, itemsize) > budget:
        tm = max(granule, _round_up(tm // 2, granule))

    m_pad = _round_up(M, tm)
    if m_pad != M:                                # pad ragged token counts
        x_tokens = jnp.pad(x_tokens, ((0, m_pad - M), (0, 0)))
    n_tok_tiles = m_pad // tm

    # ---- VMEM limit: working set + slack, clamped to physical capacity ----
    working = _working_vmem_bytes(tm, tk, n_embd, itemsize)
    vmem_limit = int(min(cap, max(working + 4 * 2**20, 32 * 2**20)))

    # ---- cost estimate: weights are re-streamed once per token tile --------
    cost = pl.CostEstimate(
        flops=2 * M * n_embd * n_hidden * 3,      # two up-proj + one down-proj
        transcendentals=M * n_hidden,             # sigmoid
        bytes_accessed=(n_tok_tiles * (w12.size + w3.size) * itemsize
                        + 2 * m_pad * n_embd * itemsize),
    )

    out = pl.pallas_call(
        functools.partial(_mlp_kernel, nk=nk),
        out_shape=jax.ShapeDtypeStruct((m_pad, n_embd), dtype),
        grid_spec=pltpu.PrefetchScalarGridSpec(
            num_scalar_prefetch=0,
            grid=(n_tok_tiles, nk),
            in_specs=[
                pl.BlockSpec((tm, n_embd), lambda i, k: (i, 0)),
                pl.BlockSpec((n_embd, 2 * tk), lambda i, k: (0, k)),
                pl.BlockSpec((tk, n_embd), lambda i, k: (k, 0)),
            ],
            out_specs=pl.BlockSpec((tm, n_embd), lambda i, k: (i, 0)),
            scratch_shapes=[pltpu.VMEM((tm, n_embd), jnp.float32)],
        ),
        compiler_params=pltpu.CompilerParams(
            dimension_semantics=("parallel", "arbitrary"),
            vmem_limit_bytes=vmem_limit,
        ),
        cost_estimate=cost,
    )(x_tokens, w12, w3)

    return out[:M]


def mlp_forward_packed(x, packed, *, tm=None):
    """x: [B, T, n_embd] with pre-packed weights from prepare_mlp_weights()."""
    w12, w3, tk = packed
    B, T, C = x.shape
    xt = x.reshape(B * T, C).astype(w3.dtype)
    y = mlp_pallas(xt, w12, w3, tk, tm=tm)
    return y.reshape(B, T, C)


def mlp_forward(x, w1, w2, w3, *, compute_dtype="auto", tm=None, tk=None):
    """Matches PyTorch MLP.forward: c_proj(silu(c_fc1(x)) * c_fc2(x)).

    For repeated calls, pack once with prepare_mlp_weights() and call
    mlp_forward_packed() so weight fusion stays out of the hot path.
    """
    packed = prepare_mlp_weights(w1, w2, w3, compute_dtype=compute_dtype, tk=tk)
    return mlp_forward_packed(x, packed, tm=tm)


# --------------------------------------------------------------------------
# pure-JAX references
# --------------------------------------------------------------------------
def _ref_forward(x, w1, w2, w3):
    h1 = x @ w1
    h2 = x @ w2
    return ((h1 * jax.nn.sigmoid(h1)) * h2) @ w3


def _ref_forward_bf16(x, w1, w2, w3):
    xb, w1b, w2b, w3b = (a.astype(jnp.bfloat16) for a in (x, w1, w2, w3))
    h1 = jnp.dot(xb, w1b, preferred_element_type=jnp.float32)
    h2 = jnp.dot(xb, w2b, preferred_element_type=jnp.float32)
    gated = (h1 * jax.nn.sigmoid(h1)) * h2
    out = jnp.dot(gated.astype(jnp.bfloat16), w3b,
                  preferred_element_type=jnp.float32)
    return out.astype(jnp.bfloat16)


if __name__ == "__main__":
    # Config mirroring the PyTorch module's __init__ math (n_embd=128 -> 512).
    n_embd = 128
    hidden_dim = 4 * n_embd
    n_hidden = int(2 * hidden_dim / 3)
    N = 256
    n_hidden = (n_hidden - 1) // N * N + N   # -> 512

    B, T = 2, 8

    key = jax.random.PRNGKey(0)
    kx, k1, k2, k3 = jax.random.split(key, 4)

    x = jax.random.normal(kx, (B, T, n_embd), dtype=jnp.float32)
    # Deterministic "Kaiming-uniform-like" init scale; stored as [in, out].
    s1 = 1.0 / math.sqrt(n_embd)
    s3 = 1.0 / math.sqrt(n_hidden)
    w1 = jax.random.uniform(k1, (n_embd, n_hidden), jnp.float32, -s1, s1)
    w2 = jax.random.uniform(k2, (n_embd, n_hidden), jnp.float32, -s1, s1)
    w3 = jax.random.uniform(k3, (n_hidden, n_embd), jnp.float32, -s3, s3)

    # f32 path with tiny tiles so BOTH grid axes (token tiles + hidden-tile
    # accumulation) are exercised at these toy shapes.
    out = mlp_forward(x, w1, w2, w3, compute_dtype=jnp.float32, tm=8, tk=256)
    jax.block_until_ready(out)
    ref = _ref_forward(x, w1, w2, w3)
    assert out.shape == (B, T, n_embd)
    assert jnp.allclose(out, ref, atol=1e-4, rtol=1e-4)

    # Default fast path: bf16 compute (full-rate MXU, halved weight DMA),
    # weights packed ONCE and reused; device-derived tm/tk/VMEM limits.
    packed = prepare_mlp_weights(w1, w2, w3)
    out_bf16 = mlp_forward_packed(x, packed)
    jax.block_until_ready(out_bf16)
    ref_bf16 = _ref_forward_bf16(
        x.reshape(B * T, n_embd), w1, w2, w3).reshape(B, T, n_embd)
    assert out_bf16.dtype == jnp.bfloat16
    assert jnp.allclose(out_bf16.astype(jnp.float32),
                        ref_bf16.astype(jnp.float32), atol=5e-2, rtol=5e-2)

    print("KERNEL_OK")
</pallas_src>

<mosaic_0001>
module attributes {stable_mosaic.version = 11 : i64} {
  func.func @_mlp_kernel(%arg0: i32, %arg1: i32, %arg2: memref<8x128xf32, #tpu.memory_space<vmem>>, %arg3: memref<128x512xf32, #tpu.memory_space<vmem>>, %arg4: memref<256x128xf32, #tpu.memory_space<vmem>>, %arg5: memref<8x128xf32, #tpu.memory_space<vmem>>, %arg6: memref<8x128xf32, #tpu.memory_space<vmem>>) attributes {dimension_semantics = [#tpu.dimension_semantics<parallel>, #tpu.dimension_semantics<arbitrary>], iteration_bounds = array<i64: 2, 2>, scalar_prefetch = 0 : i64, scratch_operands = 1 : i64, tpu.core_type = #tpu.core_type<tc>, window_params = [{transform_indices = @transform_0, window_bounds = array<i64: 8, 128>}, {transform_indices = @transform_1, window_bounds = array<i64: 128, 512>}, {transform_indices = @transform_2, window_bounds = array<i64: 256, 128>}, {transform_indices = @transform_3, window_bounds = array<i64: 8, 128>}]} {
    %c0 = arith.constant 0 : index
    %c0_0 = arith.constant 0 : index
    %0 = vector.load %arg2[%c0, %c0_0] : memref<8x128xf32, #tpu.memory_space<vmem>>, vector<8x128xf32>
    %c0_1 = arith.constant 0 : index
    %c0_2 = arith.constant 0 : index
    %1 = vector.load %arg3[%c0_1, %c0_2] : memref<128x512xf32, #tpu.memory_space<vmem>>, vector<128x512xf32>
    %cst = arith.constant dense<0.000000e+00> : vector<8x512xf32>
    %2 = tpu.matmul %0, %1, %cst {dimension_numbers = #tpu.dot_dimension_numbers<[1], [0], [0], [1], [0, 0, 1, 1], [], []>} : vector<8x128xf32>, vector<128x512xf32>, vector<8x512xf32> -> vector<8x512xf32>
    %3 = vector.extract_strided_slice %2 {offsets = [0, 0], sizes = [8, 256], strides = [1, 1]} : vector<8x512xf32> to vector<8x256xf32>
    %4 = vector.extract_strided_slice %2 {offsets = [0, 256], sizes = [8, 256], strides = [1, 1]} : vector<8x512xf32> to vector<8x256xf32>
    %5 = arith.negf %3 : vector<8x256xf32>
    %6 = math.exp %5 : vector<8x256xf32>
    %cst_3 = arith.constant 1.000000e+00 : f32
    %7 = vector.broadcast %cst_3 : f32 to vector<8x256xf32>
    %8 = arith.addf %7, %6 : vector<8x256xf32>
    %9 = arith.divf %7, %8 : vector<8x256xf32>
    %10 = arith.mulf %3, %9 : vector<8x256xf32>
    %11 = arith.mulf %10, %4 : vector<8x256xf32>
    %c0_4 = arith.constant 0 : index
    %c0_5 = arith.constant 0 : index
    %12 = vector.load %arg4[%c0_4, %c0_5] : memref<256x128xf32, #tpu.memory_space<vmem>>, vector<256x128xf32>
    %cst_6 = arith.constant dense<0.000000e+00> : vector<8x128xf32>
    %13 = tpu.matmul %11, %12, %cst_6 {dimension_numbers = #tpu.dot_dimension_numbers<[1], [0], [0], [1], [0, 0, 1, 1], [], []>} : vector<8x256xf32>, vector<256x128xf32>, vector<8x128xf32> -> vector<8x128xf32>
    %c0_i32 = arith.constant 0 : i32
    %14 = arith.cmpi eq, %arg1, %c0_i32 : i32
    %15 = arith.extui %14 : i1 to i32
    %c0_i32_7 = arith.constant 0 : i32
    %16 = arith.cmpi ne, %15, %c0_i32_7 : i32
    scf.if %16 {
      %c0_12 = arith.constant 0 : index
      %c0_13 = arith.constant 0 : index
      %25 = vector.load %arg6[%c0_12, %c0_13] : memref<8x128xf32, #tpu.memory_space<vmem>>, vector<8x128xf32>
      tpu.vector_store %arg6[%c0_12, %c0_13], %13 {strides = array<i32>} : memref<8x128xf32, #tpu.memory_space<vmem>>, vector<8x128xf32>,
    } else {
    }
    %c0_i32_8 = arith.constant 0 : i32
    %17 = arith.cmpi sgt, %arg1, %c0_i32_8 : i32
    %c1_i32 = arith.constant 1 : i32
    %18 = arith.cmpi slt, %arg1, %c1_i32 : i32
    %19 = arith.andi %17, %18 : i1
    %20 = arith.extui %19 : i1 to i32
    %c0_i32_9 = arith.constant 0 : i32
    %21 = arith.cmpi ne, %20, %c0_i32_9 : i32
    scf.if %21 {
      %c0_12 = arith.constant 0 : index
      %c0_13 = arith.constant 0 : index
      %25 = vector.load %arg6[%c0_12, %c0_13] : memref<8x128xf32, #tpu.memory_space<vmem>>, vector<8x128xf32>
      %26 = arith.addf %25, %13 : vector<8x128xf32>
      %c0_14 = arith.constant 0 : index
      %c0_15 = arith.constant 0 : index
      %27 = vector.load %arg6[%c0_14, %c0_15] : memref<8x128xf32, #tpu.memory_space<vmem>>, vector<8x128xf32>
      tpu.vector_store %arg6[%c0_14, %c0_15], %26 {strides = array<i32>} : memref<8x128xf32, #tpu.memory_space<vmem>>, vector<8x128xf32>,
    } else {
    }
    %c1_i32_10 = arith.constant 1 : i32
    %22 = arith.cmpi eq, %arg1, %c1_i32_10 : i32
    %23 = arith.extui %22 : i1 to i32
    %c0_i32_11 = arith.constant 0 : i32
    %24 = arith.cmpi ne, %23, %c0_i32_11 : i32
    scf.if %24 {
      %c0_12 = arith.constant 0 : index
      %c0_13 = arith.constant 0 : index
      %25 = vector.load %arg6[%c0_12, %c0_13] : memref<8x128xf32, #tpu.memory_space<vmem>>, vector<8x128xf32>
      %26 = arith.addf %25, %13 : vector<8x128xf32>
      %c0_14 = arith.constant 0 : index
      %c0_15 = arith.constant 0 : index
      %27 = vector.load %arg5[%c0_14, %c0_15] : memref<8x128xf32, #tpu.memory_space<vmem>>, vector<8x128xf32>
      tpu.vector_store %arg5[%c0_14, %c0_15], %26 {strides = array<i32>} : memref<8x128xf32, #tpu.memory_space<vmem>>, vector<8x128xf32>,
    } else {
    }
    return
  }
  func.func @transform_0(%arg0: i32, %arg1: i32) -> (i32, i32) {
    %c0_i32 = arith.constant 0 : i32
    %c0_i32_0 = arith.constant 0 : i32
    return %arg0, %c0_i32 : i32, i32
  }
  func.func @transform_1(%arg0: i32, %arg1: i32) -> (i32, i32) {
    %c0_i32 = arith.constant 0 : i32
    %c0_i32_0 = arith.constant 0 : i32
    return %c0_i32, %arg1 : i32, i32
  }
  func.func @transform_2(%arg0: i32, %arg1: i32) -> (i32, i32) {
    %c0_i32 = arith.constant 0 : i32
    %c0_i32_0 = arith.constant 0 : i32
    return %arg1, %c0_i32 : i32, i32
  }
  func.func @transform_3(%arg0: i32, %arg1: i32) -> (i32, i32) {
    %c0_i32 = arith.constant 0 : i32
    %c0_i32_0 = arith.constant 0 : i32
    return %arg0, %c0_i32 : i32, i32
  }
}

</mosaic_0001>

<bundles_post_ra>
// kernel: tpu_custom_call.1
= control target key start
LH: loop header
LB: loop body
LE: loop exit
PB: predicated region body
PF: predicated region fallthrough
CT: control target
= control target key end

     0   :  { %s1453_s0 = inlined_call_operand.hbm [shape: f32[16,128], index: 0, kind: input, shape index: {}]   ;;  %s1454_s1 = inlined_call_operand.hbm [shape: f32[128,1024], index: 1, kind: input, shape index: {}]   ;;  %s1455_s2 = inlined_call_operand.hbm [shape: f32[512,128], index: 2, kind: input, shape index: {}]   ;;  %s1456_s3 = inlined_call_operand.hbm [shape: f32[16,128], index: 3, kind: output, shape index: {}]  }
   0x1   :  { %1467 = sst [smem:[#allocation22_spill]] %s1454_s1 }
   0x2   :  { %1468 = sst [smem:[#allocation23_spill]] %s1456_s3 }
   0x3   :  { %8 = vsyncpa [#allocation4], 0 }
   0x4   :  { %10 = vsyncpa [#allocation4 + $0x1], 0 }
   0x5   :  { %11 = vsyncpa [#allocation7], 0 }
   0x6   :  { %13 = vsyncpa [#allocation7 + $0x1], 0 }
   0x7   :  { %14 = vsyncpa [#allocation5], 0 }
   0x8   :  { %16 = vsyncpa [#allocation5 + $0x1], 0  ;;  %s1098_s12 = smov 0   ;;  %s1100_s13 = smov 0  }
   0x9   :  { %s1102_s14 = smov 0   ;;  %s1104_s15 = smov 0  }
   0xa   :  { %s1106_s16 = smov 0   ;;  %s1108_s17 = smov 0  }
   0xb   :  { %s1110_s18 = smov 0   ;;  %s1112_s19 = smov 0  }
   0xc   :  { %s1114_s20 = smov 0   ;;  %s1116_s21 = smov 0  }
   0xd   :  { %s1118_s22 = smov 0  }
   0xe LB: > { %1469 = sst [smem:[#allocation13_spill]] %s1043_s15  ;;  %p49_p0 = scmp.eq.s32.totalorder %s1071_s22, 0  ;;  %s1071_s22 = sphi %s1118_s22, %s22_s22   ;;  %s1067_s21 = sphi %s1116_s21, %s1496_s21   ;;  %s1063_s20 = sphi %s1114_s20, %s1503_s20   ;;  %s1059_s19 = sphi %s1112_s19, %s1494_s19   ;;  %s1055_s18 = sphi %s1110_s18, %s1502_s18   ;;  %s1051_s17 = sphi %s1108_s17, %s1493_s17   ;;  %s1047_s16 = sphi %s1106_s16, %s1501_s16   ;;  %s1043_s15 = sphi %s1104_s15, %s1500_s15   ;;  %s1039_s14 = sphi %s1102_s14, %s1499_s14   ;;  %s1035_s13 = sphi %s1100_s13, %s1498_s13   ;;  %s1031_s12 = sphi %s1098_s12, %s1497_s12  }
   0xf   : > { %1470 = sst [smem:[#allocation14_spill]] %s1051_s17  ;;  %s67_s23 = sadd.s32 1, %s1039_s14 }
  0x10   : > { %1471 = sst [smem:[#allocation15_spill]] %s1067_s21  ;;  %p74_p1 = scmp.ne.s32.totalorder %s1039_s14, %s1035_s13 }
  0x11   : > { %p752_p2 = scmp.lt.s32.totalorder %s1071_s22, 4  ;;  %s175_s24 = sand.u32 1, %s1071_s22  }
  0x12   : > { %p76_p3 = por %p74_p1, %p49_p0  ;;  %s1457_s25 = sand.u32 1, %s1039_s14  }
  0x13   : > { %s728_s26 = sshll.u32 %s1063_s20, 5  ;;  %s709_s27 = sshll.u32 %s1457_s25, 9 }
  0x14   : > { %s1472_s1 = sld [smem:[#allocation22_spill]]  ;;  %s179_s5 = scalar_lea.vmem [#allocation6], %s709_s27 }
  0x15   : > { %s187_s6 = sshll.u32 %s179_s5, 4  ;;  %p1170_p4 = pnand %p752_p2, %p76_p3  ;;  %s188_s6 = int_to_ptr.vmem [resolvable:$true] %s187_s6 }
  0x16   : > { %s1174_s8 = scalar_lea.sflag [#allocation7], %s175_s24  ;;  %s1073_s9 = smov 1024  }
  0x17   : > { %s1074_s10 = smov 512   ;;  %s1075_s11 = smov 32  }
  0x18   : > { %p715_p5 = scmp.ge.s32.totalorder %s1071_s22, 1  ;;  %p217_p6 = scmp.lt.s32.totalorder %s1071_s22, 5 }
  0x19   : > { %s704_s27 = sadd.s32 4294967294, %s1071_s22   ;;  %s31_s28 = sadd.s32 1, %s1063_s20 }
  0x1a   : > { %s184_s30 = scalar_lea.hbm %s1472_s1, %s728_s26  ;;  %p1181_p7 = pnand %p715_p5, %p217_p6 }
  0x1b   : > { %s185_s4 = sshll.u32 %s184_s30, 4  ;;  %s1186_s26 = sadd.s32 4294967295, %s1071_s22   ;;  %s186_s4 = int_to_ptr.hbm [resolvable:$true] %s185_s4 }
  0x1c   : > { %744 = dma.hbm_to_vmem [thread:$0]  (!%p1170_p4), %s186_s4, 8192, %s188_s6, %s1174_s8, %s1073_s9, %s1074_s10, %s1075_s11  }
  0x1d   : > { %p32_p8 = scmp.ge.s32.totalorder %s31_s28, 2  ;;  %s34_s29 = sadd.s32 1, %s1067_s21 }
  0x1e   : > { %s41_s30 = sadd.s32 1, %s1051_s17  ;;  %p48_p9 = scmp.ne.s32.totalorder %s1051_s17, %s1047_s16 }
  0x1f   : > { %s1505_s28 = smov (%p32_p8, %s31_s28), 0  ;;  %s1507_s29 = smov (!%p32_p8, %s34_s29), %s1067_s21 }
  0x20   : > { %1475 = sst [smem:[#allocation16_spill]] %s1505_s28  ;;  %p1202_p10 = por %p49_p0, %p48_p9 }
  0x21   : > { %p54_p11 = scmp.ne.s32.totalorder %s1047_s16, %s1043_s15  ;;  %p36_p12 = scmp.ge.s32.totalorder %s1507_s29, 2 }
  0x22   : > { %p55_p13 = scmp.eq.s32.totalorder %s1186_s26, 0  ;;  %s64_s5 = ssub.s32 %s1063_s20, %s1505_s28 }
  0x23   : > { %p80_p1 = scmp.ne.s32.totalorder %s1035_s13, %s1031_s12  ;;  %s1509_s29 = smov (%p36_p12, %s1507_s29), 0 }
  0x24   : > { %1477 = sst [smem:[#allocation17_spill]] %s1509_s29  ;;  %p1218_p3 = por %p55_p13, %p54_p11 }
  0x25   : > { %p65_p0 = scmp.eq.s32.totalorder %s64_s5, 0  ;;  %s38_s9 = ssub.s32 %s1067_s21, %s1509_s29 }
  0x26   : > { %p1224_p5 = por %p80_p1, %p55_p13  ;;  %p39_p6 = scmp.eq.s32.totalorder %s38_s9, 0 }
  0x27   : > { %p130_p8 = scmp.eq.s32.totalorder %s1186_s26, 3  ;;  %p136_p13 = scmp.eq.s32.totalorder %s704_s27, 3 }
  0x28   : > { %s1232_s12 = scalar_select %p65_p0, %s1039_s14, %s67_s23  }
  0x29   : > { %s1235_s11 = scalar_select %p39_p6, %s1051_s17, %s41_s30  }
  0x2a   : > { %1480 = sst [smem:[#allocation18_spill]] %s1232_s12  ;;  %p1240_p12 = por %p130_p8, %p48_p9 }
  0x2b   : > { %1481 = sst [smem:[#allocation19_spill]] %s1235_s11  ;;  %s156_s5 = sand.u32 1, %s1051_s17  }
  0x2c   : > { %s1482_s25 = scalar_select %p1240_p12, 1, 0 }
  0x2d   : > { %s708_s1 = sshll.u32 %s1067_s21, 3  ;;  %p1249_p1 = por %p136_p13, %p54_p11 }
  0x2e   : > { %1483 = sst [smem:[#allocation20_spill]] %s1482_s25  ;;  %s707_s29 = sshll.u32 %s156_s5, 3 }
  0x2f   : > { %s1484_s9 = scalar_select %p1249_p1, 1, 0 }
  0x30   : > { %s164_s12 = scalar_lea.hbm %s1453_s0, %s708_s1  ;;  %s160_s11 = scalar_lea.vmem [#allocation3], %s707_s29 }
  0x31   : > { %1485 = sst [smem:[#allocation21_spill]] %s1484_s9  ;;  %s166_s30 = sshll.u32 %s164_s12, 4  ;;  %s167_s30 = int_to_ptr.hbm [resolvable:$true] %s166_s30 }
  0x32   : > { %s168_s3 = sshll.u32 %s160_s11, 4  ;;  %p739_p9 = pnand %p752_p2, %p1202_p10  ;;  %s169_s3 = int_to_ptr.vmem [resolvable:$true] %s168_s3 }
  0x33   : > { %s1486_s27 = sand.u32 1, %s1039_s14   ;;  %s729_s17 = sshll.u32 %s1063_s20, 8 }
  0x34   : > { %s712_s21 = sshll.u32 %s1486_s27, 8  ;;  %s157_s15 = scalar_lea.sflag [#allocation4], %s156_s5 }
  0x35   : > { %741 = dma.hbm_to_vmem [thread:$0]  (!%p739_p9), %s167_s30, 128, %s169_s3, %s157_s15  }
  0x36   : > { %s206_s28 = scalar_lea.hbm %s1455_s2, %s729_s17  ;;  %s201_s1 = scalar_lea.vmem [#allocation8], %s712_s21 }
  0x37   : > { %s209_s12 = sshll.u32 %s201_s1, 4  ;;  %s207_s23 = sshll.u32 %s206_s28, 4  ;;  %s210_s12 = int_to_ptr.vmem [resolvable:$true] %s209_s12  ;;  %s208_s23 = int_to_ptr.hbm [resolvable:$true] %s207_s23 }
  0x38   : > { %s1076_s29 = smov 128   ;;  %s1077_s11 = smov 8  }
  0x39   : > { %747 = dma.hbm_to_vmem [thread:$0]  (!%p1170_p4), %s208_s23, 4096, %s210_s12, %s1174_s8, %s1076_s29, %s1076_s29, %s1077_s11  }
  0x3a   : > { %221 = sbr.rel (%p1181_p7) target bundleno = 432 (0x1b0), region = 32  ;;  %s1272_s4 = sand.u32 (!%p1181_p7), 1, %s1047_s16  }
  0x3b   : > { %s716_s3 = sshll.u32 (!%p1181_p7), %s1272_s4, 3  ;;  %s224_s15 = scalar_lea.sflag (!%p1181_p7), [#allocation4], %s1272_s4 }
  0x3c   : > { %s1278_s17 = scalar_lea.vmem (!%p1181_p7), [#allocation3], %s716_s3 }
  0x3f   : > { %1018 = dma.done.wait (%p1218_p3), %s224_s15, 128  }
  0x40   : > { %1020 = vsyncadd (%p1218_p3), %s224_s15, 4294967168  ;;  %s233_s21 = sand.u32 1, %s1186_s26   ;;  %s235_s25 = sand.u32 1, %s1035_s13  }
  0x41   : > { %s717_s7 = sshll.u32 %s235_s25, 9  ;;  %s234_s8 = scalar_lea.sflag [#allocation7], %s233_s21 }
  0x42   : > { %s1288_s24 = scalar_lea.vmem [#allocation6], %s717_s7 }
  0x43   : > { %1022 = dma.done.wait (%p1224_p5), %s234_s8, 12288  }
  0x44   : > { %1024 = vsyncadd (%p1224_p5), %s234_s8, 4294955008  ;;  %v344_v0 = vld [vmem:[%s1288_s24 + $0x1e0] sm:$0xff]  ;;  %v345_v1 = vld [vmem:[%s1288_s24 + $0x1e8] sm:$0xff]  ;;  %s718_s26 = sshll.u32 %s235_s25, 8  ;;  %s280_s10 = scalar_lea.vmem [#allocation9], %s716_s3 }
  0x45   : > { %v340_v2 = vld [vmem:[%s1288_s24 + $0x1c0] sm:$0xff]  ;;  %348 = vmatpush.msra.mxu0 %v344_v0  ;;  %368 = vmatpush.msra.mxu1 %v345_v1  ;;  %v341_v3 = vld [vmem:[%s1288_s24 + $0x1c8] sm:$0xff]  ;;  %v346_v12 = vld [vmem:[%s1288_s24 + $0x1f0] sm:$0xff]  ;;  %s1361_s6 = scalar_lea.vmem [#allocation8], %s718_s26  ;;  %p722_p2 = scmp.ne.s32.totalorder %s1055_s18, 0 }
  0x46   : > { %v336_v4 = vld [vmem:[%s1288_s24 + $0x1a0] sm:$0xff]  ;;  %v337_v5 = vld [vmem:[%s1288_s24 + $0x1a8] sm:$0xff]  ;;  %v347_v14 = vld [vmem:[%s1288_s24 + $0x1f8] sm:$0xff]  ;;  %388 = vmatpush.msra.mxu2 %v346_v12 }
  0x47   : > { %349 = vmatpush.msra.mxu0 %v340_v2  ;;  %369 = vmatpush.msra.mxu1 %v341_v3  ;;  %v332_v6 = vld [vmem:[%s1288_s24 + $0x180] sm:$0xff]  ;;  %v333_v7 = vld [vmem:[%s1288_s24 + $0x188] sm:$0xff]  ;;  %v342_v16 = vld [vmem:[%s1288_s24 + $0x1d0] sm:$0xff] }
  0x48   : > { %v328_v8 = vld [vmem:[%s1288_s24 + $0x160] sm:$0xff]  ;;  %v329_v9 = vld [vmem:[%s1288_s24 + $0x168] sm:$0xff]  ;;  %408 = vmatpush.msra.mxu3 %v347_v14  ;;  %v343_v17 = vld [vmem:[%s1288_s24 + $0x1d8] sm:$0xff]  ;;  %389 = vmatpush.msra.mxu2 %v342_v16 }
  0x49   : > { %350 = vmatpush.msra.mxu0 %v336_v4  ;;  %370 = vmatpush.msra.mxu1 %v337_v5  ;;  %v324_v10 = vld [vmem:[%s1288_s24 + $0x140] sm:$0xff]  ;;  %v325_v11 = vld [vmem:[%s1288_s24 + $0x148] sm:$0xff]  ;;  %v338_v18 = vld [vmem:[%s1288_s24 + $0x1b0] sm:$0xff] }
  0x4a   : > { %v320_v13 = vld [vmem:[%s1288_s24 + $0x120] sm:$0xff]  ;;  %v321_v15 = vld [vmem:[%s1288_s24 + $0x128] sm:$0xff]  ;;  %v339_v19 = vld [vmem:[%s1288_s24 + $0x1b8] sm:$0xff]  ;;  %409 = vmatpush.msra.mxu3 %v343_v17  ;;  %390 = vmatpush.msra.mxu2 %v338_v18 }
  0x4b   : > { %351 = vmatpush.msra.mxu0 %v332_v6  ;;  %371 = vmatpush.msra.mxu1 %v333_v7  ;;  %v316_v20 = vld [vmem:[%s1288_s24 + $0x100] sm:$0xff]  ;;  %v317_v21 = vld [vmem:[%s1288_s24 + $0x108] sm:$0xff]  ;;  %v334_v22 = vld [vmem:[%s1288_s24 + $0x190] sm:$0xff] }
  0x4c   : > { %v335_v23 = vld [vmem:[%s1288_s24 + $0x198] sm:$0xff]  ;;  %v312_v24 = vld [vmem:[%s1288_s24 + $0xe0] sm:$0xff]  ;;  %v313_v25 = vld [vmem:[%s1288_s24 + $0xe8] sm:$0xff]  ;;  %410 = vmatpush.msra.mxu3 %v339_v19  ;;  %391 = vmatpush.msra.mxu2 %v334_v22 }
  0x4d   : > { %352 = vmatpush.msra.mxu0 %v328_v8  ;;  %372 = vmatpush.msra.mxu1 %v329_v9  ;;  %v330_v26 = vld [vmem:[%s1288_s24 + $0x170] sm:$0xff]  ;;  %v331_v27 = vld [vmem:[%s1288_s24 + $0x178] sm:$0xff]  ;;  %v308_v28 = vld [vmem:[%s1288_s24 + $0xc0] sm:$0xff] }
  0x4e   : > { %v309_v29 = vld [vmem:[%s1288_s24 + $0xc8] sm:$0xff]  ;;  %411 = vmatpush.msra.mxu3 %v335_v23  ;;  %v326_v30 = vld [vmem:[%s1288_s24 + $0x150] sm:$0xff]  ;;  %v327_v31 = vld [vmem:[%s1288_s24 + $0x158] sm:$0xff]  ;;  %392 = vmatpush.msra.mxu2 %v330_v26 }
  0x4f   : > { %353 = vmatpush.msra.mxu0 %v324_v10  ;;  %373 = vmatpush.msra.mxu1 %v325_v11  ;;  %v304_v32 = vld [vmem:[%s1288_s24 + $0xa0] sm:$0xff]  ;;  %v305_v33 = vld [vmem:[%s1288_s24 + $0xa8] sm:$0xff]  ;;  %v322_v34 = vld [vmem:[%s1288_s24 + $0x130] sm:$0xff] }
  0x50   : > { %412 = vmatpush.msra.mxu3 %v331_v27  ;;  %v323_v35 = vld [vmem:[%s1288_s24 + $0x138] sm:$0xff]  ;;  %v300_v36 = vld [vmem:[%s1288_s24 + $0x80] sm:$0xff]  ;;  %v301_v37 = vld [vmem:[%s1288_s24 + $0x88] sm:$0xff]  ;;  %393 = vmatpush.msra.mxu2 %v326_v30 }
  0x51   : > { %354 = vmatpush.msra.mxu0 %v320_v13  ;;  %374 = vmatpush.msra.mxu1 %v321_v15  ;;  %v318_v38 = vld [vmem:[%s1288_s24 + $0x110] sm:$0xff]  ;;  %v319_v39 = vld [vmem:[%s1288_s24 + $0x118] sm:$0xff]  ;;  %v296_v40 = vld [vmem:[%s1288_s24 + $0x60] sm:$0xff] }
  0x52   : > { %413 = vmatpush.msra.mxu3 %v327_v31  ;;  %v297_v41 = vld [vmem:[%s1288_s24 + $0x68] sm:$0xff]  ;;  %394 = vmatpush.msra.mxu2 %v322_v34  ;;  %v314_v42 = vld [vmem:[%s1288_s24 + $0xf0] sm:$0xff]  ;;  %v315_v43 = vld [vmem:[%s1288_s24 + $0xf8] sm:$0xff] }
  0x53   : > { %355 = vmatpush.msra.mxu0 %v316_v20  ;;  %375 = vmatpush.msra.mxu1 %v317_v21  ;;  %v292_v44 = vld [vmem:[%s1288_s24 + $0x40] sm:$0xff]  ;;  %v293_v45 = vld [vmem:[%s1288_s24 + $0x48] sm:$0xff]  ;;  %v310_v46 = vld [vmem:[%s1288_s24 + $0xd0] sm:$0xff] }
  0x54   : > { %414 = vmatpush.msra.mxu3 %v323_v35  ;;  %395 = vmatpush.msra.mxu2 %v318_v38  ;;  %v311_v47 = vld [vmem:[%s1288_s24 + $0xd8] sm:$0xff]  ;;  %v288_v48 = vld [vmem:[%s1288_s24 + $0x20] sm:$0xff]  ;;  %v289_v49 = vld [vmem:[%s1288_s24 + $0x28] sm:$0xff] }
  0x55   : > { %356 = vmatpush.msra.mxu0 %v312_v24  ;;  %376 = vmatpush.msra.mxu1 %v313_v25  ;;  %v306_v50 = vld [vmem:[%s1288_s24 + $0xb0] sm:$0xff]  ;;  %v307_v51 = vld [vmem:[%s1288_s24 + $0xb8] sm:$0xff]  ;;  %v284_v52 = vld [vmem:[%s1288_s24] sm:$0xff] }
  0x56   : > { %415 = vmatpush.msra.mxu3 %v319_v39  ;;  %396 = vmatpush.msra.mxu2 %v314_v42  ;;  %v285_v53 = vld [vmem:[%s1288_s24 + $0x8] sm:$0xff]  ;;  %v283_v54 = vld [vmem:[%s1278_s17] sm:$0xff]  ;;  %v482_v7 = vld [vmem:[%s1361_s6 + $0x60] sm:$0xff] }
  0x57   : > { %357 = vmatpush.msra.mxu0 %v308_v28  ;;  %377 = vmatpush.msra.mxu1 %v309_v29  ;;  %v302_v55 = vld [vmem:[%s1288_s24 + $0x90] sm:$0xff]  ;;  %v303_v56 = vld [vmem:[%s1288_s24 + $0x98] sm:$0xff]  ;;  %v483_v5 = vld [vmem:[%s1361_s6 + $0x68] sm:$0xff] }
  0x58   : > { %416 = vmatpush.msra.mxu3 %v315_v43  ;;  %397 = vmatpush.msra.mxu2 %v310_v46  ;;  %v298_v57 = vld [vmem:[%s1288_s24 + $0x70] sm:$0xff]  ;;  %v299_v58 = vld [vmem:[%s1288_s24 + $0x78] sm:$0xff]  ;;  %v499_v6 = vld [vmem:[%s1361_s6 + $0xe8] sm:$0xff] }
  0x59   : > { %358 = vmatpush.msra.mxu0 %v304_v32  ;;  %378 = vmatpush.msra.mxu1 %v305_v33  ;;  %v294_v59 = vld [vmem:[%s1288_s24 + $0x50] sm:$0xff]  ;;  %v295_v60 = vld [vmem:[%s1288_s24 + $0x58] sm:$0xff]  ;;  %v498_v8 = vld [vmem:[%s1361_s6 + $0xe0] sm:$0xff] }
  0x5a   : > { %417 = vmatpush.msra.mxu3 %v311_v47  ;;  %398 = vmatpush.msra.mxu2 %v306_v50  ;;  %v290_v61 = vld [vmem:[%s1288_s24 + $0x30] sm:$0xff]  ;;  %v291_v62 = vld [vmem:[%s1288_s24 + $0x38] sm:$0xff]  ;;  %v479_v13 = vld [vmem:[%s1361_s6 + $0x48] sm:$0xff] }
  0x5b   : > { %359 = vmatpush.msra.mxu0 %v300_v36  ;;  %379 = vmatpush.msra.mxu1 %v301_v37  ;;  %v286_v63 = vld [vmem:[%s1288_s24 + $0x10] sm:$0xff]  ;;  %v287_v0 = vld [vmem:[%s1288_s24 + $0x18] sm:$0xff]  ;;  %v495_v14 = vld [vmem:[%s1361_s6 + $0xc8] sm:$0xff] }
  0x5c   : > { %418 = vmatpush.msra.mxu3 %v307_v51  ;;  %399 = vmatpush.msra.mxu2 %v302_v55  ;;  %v485_v1 = vld [vmem:[%s1361_s6 + $0x78] sm:$0xff]  ;;  %v484_v3 = vld [vmem:[%s1361_s6 + $0x70] sm:$0xff]  ;;  %v478_v15 = vld [vmem:[%s1361_s6 + $0x40] sm:$0xff] }
  0x5d   : > { %360 = vmatpush.msra.mxu0 %v296_v40  ;;  %380 = vmatpush.msra.mxu1 %v297_v41  ;;  %v501_v2 = vld [vmem:[%s1361_s6 + $0xf8] sm:$0xff]  ;;  %v500_v4 = vld [vmem:[%s1361_s6 + $0xf0] sm:$0xff]  ;;  %v494_v16 = vld [vmem:[%s1361_s6 + $0xc0] sm:$0xff] }
  0x5e   : > { %419 = vmatpush.msra.mxu3 %v303_v56  ;;  %400 = vmatpush.msra.mxu2 %v298_v57  ;;  %v481_v9 = vld [vmem:[%s1361_s6 + $0x58] sm:$0xff]  ;;  %v480_v11 = vld [vmem:[%s1361_s6 + $0x50] sm:$0xff]  ;;  %v475_v21 = vld [vmem:[%s1361_s6 + $0x28] sm:$0xff] }
  0x5f   : > { %361 = vmatpush.msra.mxu0 %v292_v44  ;;  %381 = vmatpush.msra.mxu1 %v293_v45  ;;  %v497_v10 = vld [vmem:[%s1361_s6 + $0xd8] sm:$0xff]  ;;  %v496_v12 = vld [vmem:[%s1361_s6 + $0xd0] sm:$0xff]  ;;  %v491_v22 = vld [vmem:[%s1361_s6 + $0xa8] sm:$0xff] }
  0x60   : > { %420 = vmatpush.msra.mxu3 %v299_v58  ;;  %401 = vmatpush.msra.mxu2 %v294_v59  ;;  %v477_v17 = vld [vmem:[%s1361_s6 + $0x38] sm:$0xff]  ;;  %v476_v19 = vld [vmem:[%s1361_s6 + $0x30] sm:$0xff]  ;;  %v474_v23 = vld [vmem:[%s1361_s6 + $0x20] sm:$0xff] }
  0x61   : > { %362 = vmatpush.msra.mxu0 %v288_v48  ;;  %382 = vmatpush.msra.mxu1 %v289_v49  ;;  %v493_v18 = vld [vmem:[%s1361_s6 + $0xb8] sm:$0xff]  ;;  %v492_v20 = vld [vmem:[%s1361_s6 + $0xb0] sm:$0xff]  ;;  %v490_v24 = vld [vmem:[%s1361_s6 + $0xa0] sm:$0xff] }
  0x62   : > { %421 = vmatpush.msra.mxu3 %v295_v60  ;;  %402 = vmatpush.msra.mxu2 %v290_v61  ;;  %v473_v25 = vld [vmem:[%s1361_s6 + $0x18] sm:$0xff]  ;;  %v472_v27 = vld [vmem:[%s1361_s6 + $0x10] sm:$0xff]  ;;  %v471_v29 = vld [vmem:[%s1361_s6 + $0x8] sm:$0xff] }
  0x63   : > { %363 = vmatpush.msra.mxu0 %v284_v52  ;;  %383 = vmatpush.msra.mxu1 %v285_v53  ;;  %v489_v26 = vld [vmem:[%s1361_s6 + $0x98] sm:$0xff]  ;;  %v488_v28 = vld [vmem:[%s1361_s6 + $0x90] sm:$0xff]  ;;  %v487_v30 = vld [vmem:[%s1361_s6 + $0x88] sm:$0xff] }
  0x64   : > { %364 = vmatmul.f32.vlgmr.msra.gmra.mxu0 %v283_v54  ;;  %384 = vmatmul.f32.vlgmr.msra.gmra.mxu1 %v283_v54  ;;  %v470_v33 = vld [vmem:[%s1361_s6] sm:$0xff] }
  0x65   : > { %422 = vmatpush.msra.mxu3 %v291_v62  ;;  %403 = vmatpush.msra.mxu2 %v286_v63  ;;  %v486_v34 = vld [vmem:[%s1361_s6 + $0x80] sm:$0xff] }
  0x66   : > { %404 = vmatmul.f32.vlgmr.msra.gmra.mxu2 %v283_v54  ;;  %502 = vmatpush.msrb.mxu0 %v485_v1 }
  0x67   : > { %423 = vmatpush.msra.mxu3 %v287_v0  ;;  %522 = vmatpush.msrb.mxu1 %v501_v2 }
  0x68   : > { %424 = vmatmul.f32.vlgmr.msra.gmra.mxu3 %v283_v54  ;;  %503 = vmatpush.msrb.mxu0 %v484_v3 }
  0x69   : > { %523 = vmatpush.msrb.mxu1 %v500_v4 }
  0x6a   : > { %504 = vmatpush.msrb.mxu0 %v483_v5 }
  0x6b   : > { %524 = vmatpush.msrb.mxu1 %v499_v6 }
  0x6c   : > { %505 = vmatpush.msrb.mxu0 %v482_v7 }
  0x6d   : > { %525 = vmatpush.msrb.mxu1 %v498_v8 }
  0x6e   : > { %506 = vmatpush.msrb.mxu0 %v481_v9 }
  0x6f   : > { %526 = vmatpush.msrb.mxu1 %v497_v10 }
  0x70   : > { %507 = vmatpush.msrb.mxu0 %v480_v11 }
  0x71   : > { %527 = vmatpush.msrb.mxu1 %v496_v12 }
  0x72   : > { %508 = vmatpush.msrb.mxu0 %v479_v13 }
  0x73   : > { %528 = vmatpush.msrb.mxu1 %v495_v14 }
  0x74   : > { %509 = vmatpush.msrb.mxu0 %v478_v15 }
  0x75   : > { %529 = vmatpush.msrb.mxu1 %v494_v16 }
  0x76   : > { %510 = vmatpush.msrb.mxu0 %v477_v17 }
  0x77   : > { %530 = vmatpush.msrb.mxu1 %v493_v18 }
  0x78   : > { %511 = vmatpush.msrb.mxu0 %v476_v19 }
  0x79   : > { %531 = vmatpush.msrb.mxu1 %v492_v20 }
  0x7a   : > { %512 = vmatpush.msrb.mxu0 %v475_v21 }
  0x7b   : > { %532 = vmatpush.msrb.mxu1 %v491_v22 }
  0x7c   : > { %513 = vmatpush.msrb.mxu0 %v474_v23 }
  0x7d   : > { %533 = vmatpush.msrb.mxu1 %v490_v24 }
  0x7e   : > { %514 = vmatpush.msrb.mxu0 %v473_v25 }
  0x7f   : > { %534 = vmatpush.msrb.mxu1 %v489_v26 }
  0x80   : > { %515 = vmatpush.msrb.mxu0 %v472_v27 }
  0x81   : > { %535 = vmatpush.msrb.mxu1 %v488_v28 }
  0x82   : > { %516 = vmatpush.msrb.mxu0 %v471_v29 }
  0x83   : > { %536 = vmatpush.msrb.mxu1 %v487_v30 }
  0x84   : > { %517 = vmatpush.msrb.mxu0 %v470_v33 }
  0x85   : > { %537 = vmatpush.msrb.mxu1 %v486_v34 }
  0xe1   : > { %v365_v31 = vpop.f32.mrf.mxu0  ;;  %v385_v32 = vpop.f32.mrf.mxu1 }
  0xe2   : > { %v720_v35 = vmul.f32 -1.442695, %v365_v31  ;;  %v721_v36 = vmul.f32 -1.442695, %v385_v32 }
  0xe4   : > { %847 = vpow2.f32 %v720_v35 }
  0xe5   : > { %849 = vpow2.f32 %v721_v36 }
  0xe9   : > { %v405_v60 = vpop.f32.mrf.mxu2 }
  0xea   : > { %v848_v37 = vpop.eup %847 }
  0xeb   : > { %v850_v38 = vpop.eup %849  ;;  %v434_v39 = vadd.f32 1.0, %v848_v37  ;;  %v425_v63 = vpop.f32.mrf.mxu3 }
  0xec   : > { %v435_v40 = vadd.f32 1.0, %v850_v38 }
  0xed   : > { %851 = vrcp.f32 %v434_v39  ;;  %v447_v46 = vand.u32 2147483648, %v434_v39  ;;  %v445_v49 = vand.u32 2147483647, %v434_v39  ;;  %vm441_vm2 = vweird.f32 %v434_v39 }
  0xee   : > { %853 = vrcp.f32 %v435_v40  ;;  %v462_v50 = vand.u32 2147483648, %v435_v40  ;;  %v460_v52 = vand.u32 2147483647, %v435_v40  ;;  %vm456_vm4 = vweird.f32 %v435_v40 }
  0xef   : > { %v448_v54 = vor.u32 1.1754944e-38, %v447_v46  ;;  %vm446_vm5 = vcmp.eq.f32.partialorder %v445_v49, 8.507059e+37 }
  0xf0   : > { %v463_v57 = vor.u32 1.1754944e-38, %v462_v50  ;;  %vm461_vm7 = vcmp.eq.f32.partialorder %v460_v52, 8.507059e+37 }
  0xf3   : > { %v852_v41 = vpop.eup %851 }
  0xf4   : > { %v854_v42 = vpop.eup %853  ;;  %v437_v43 = vmul.f32 %v852_v41, %v434_v39  ;;  %vm442_vm0 = vweird.f32 %v852_v41 }
  0xf5   : > { %v452_v44 = vmul.f32 %v854_v42, %v435_v40  ;;  %vm457_vm1 = vweird.f32 %v854_v42  ;;  %vm443_vm3 = vmor %vm441_vm2, %vm442_vm0 }
  0xf6   : > { %v438_v45 = vsub.f32 1.0, %v437_v43  ;;  %vm458_vm6 = vmor %vm456_vm4, %vm457_vm1 }
  0xf7   : > { %v453_v47 = vsub.f32 1.0, %v452_v44 }
  0xf8   : > { %v439_v48 = vmul.f32 %v852_v41, %v438_v45 }
  0xf9   : > { %v454_v51 = vmul.f32 %v854_v42, %v453_v47 }
  0xfa   : > { %v440_v53 = vadd.f32 %v852_v41, %v439_v48 }
  0xfb   : > { %v455_v55 = vadd.f32 %v854_v42, %v454_v51 }
  0xfc   : > { %v444_v56 = vsel %vm443_vm3, %v852_v41, %v440_v53 }
  0xfd   : > { %v449_v58 = vsel %vm446_vm5, %v448_v54, %v444_v56  ;;  %v459_v59 = vsel %vm458_vm6, %v854_v42, %v455_v55 }
  0xfe   : > { %v466_v61 = vmul.f32 %v449_v58, %v365_v31  ;;  %v464_v62 = vsel %vm461_vm7, %v463_v57, %v459_v59 }
  0xff   : > { %v467_v0 = vmul.f32 %v464_v62, %v385_v32 }
 0x100   : > { %v468_v1 = vmul.f32 %v466_v61, %v405_v60 }
 0x101   : > { %v469_v2 = vmul.f32 %v467_v0, %v425_v63 }
 0x102   : > { %518 = vmatmul.f32.vlgmr.msrb.gmra.mxu0 %v468_v1 }
 0x103   : > { %538 = vmatmul.f32.vlgmr.msrb.gmra.mxu1 %v469_v2 }
 0x17d   : > { %545 = sbr.rel (%p722_p2) target bundleno = 388 (0x184), region = 48 }
 0x17f   : > { %v519_v3 = vpop.f32.mrf.mxu0 }
 0x180   : > { %v539_v4 = vpop.f32.mrf.mxu1 }
 0x181   : > { %v540_v5 = vadd.f32 %v539_v4, %v519_v3 }
 0x183   : > { %546 = vst [vmem:[#allocation2] sm:$0xff] %v540_v5 }
 0x184 PF: > { %p547_p4 = scmp.gt.s32.totalorder %s1055_s18, 0  ;;  %p548_p7 = scmp.lt.s32.totalorder %s1055_s18, 1 }
 0x186   : > { %p549_p10 = pnand %p548_p7, %p547_p4 }
 0x188   : > { %552 = sbr.rel (%p549_p10) target bundleno = 401 (0x191), region = 52 }
 0x18d   : > { %v553_v6 = vld [vmem:[#allocation2] sm:$0xff] }
 0x18e   : > { %v554_v7 = vadd.f32 %v553_v6, %v540_v5 }
 0x190   : > { %555 = vst [vmem:[#allocation2] sm:$0xff] %v554_v7 }
 0x191 PF: > { %p723_p11 = scmp.ne.s32.totalorder %s1055_s18, 1 }
 0x193   : > { %559 = sbr.rel (%p723_p11) target bundleno = 412 (0x19c), region = 56 }
 0x198   : > { %v560_v8 = vld [vmem:[#allocation2] sm:$0xff] }
 0x199   : > { %v561_v9 = vadd.f32 %v560_v8, %v540_v5 }
 0x19b   : > { %562 = vst [vmem:[%s280_s10] sm:$0xff] %v561_v9 }
 0x19c PF: > { %s725_s9 = sshll.u32 %s1059_s19, 3  ;;  %s1488_s28 = sld [smem:[#allocation23_spill]] }
 0x19d   : > { %s576_s12 = sshll.u32 %s280_s10, 4  ;;  %s564_s29 = scalar_lea.sflag [#allocation5], %s1272_s4  ;;  %s577_s12 = int_to_ptr.vmem [resolvable:$true] %s576_s12 }
 0x1a2   : > { %s574_s1 = scalar_lea.hbm %s1488_s28, %s725_s9  ;;  %s965_s19 = scalar_lea.hbm %s1488_s28, 16 }
 0x1a3   : > { %s578_s23 = sshll.u32 %s574_s1, 4  ;;  %s579_s23 = int_to_ptr.hbm [resolvable:$true] %s578_s23 }
 0x1a4   : > { %s959_s11 = sshra.s32 %s579_s23, 4  ;;  %s960_s11 = int_to_ptr.hbm [resolvable:$true] %s959_s11 }
 0x1a5   : > { %s961_s18 = scalar_lea.hbm %s960_s11, 8  ;;  %p966_p6 = scmp.lt.s32.totalorder %s960_s11, %s1488_s28 }
 0x1a6   : > { %p962_p3 = scmp.ne.s32.totalorder %s960_s11, %s961_s18  ;;  %p967_p8 = scmp.lt.s32.totalorder %s965_s19, %s961_s18 }
 0x1a8   : > { %p963_p0 = pnand %p962_p3, %p1240_p12  ;;  %p968_p13 = por %p967_p8, %p966_p6 }
 0x1aa   : > { %p964_p5 = pneg %p963_p0 }
 0x1ac   : > { %p969_p9 = pnand %p968_p13, %p964_p5 }
 0x1ae   : > { %972 = shalt.err (!%p969_p9)
}
 0x1af   : > { %736 = dma.vmem_to_hbm [thread:$0]  (%p1240_p12), %s577_s12, 128, %s579_s23, %s564_s29  }
 0x1b0 PF: > { %s1489_s4 = sld [smem:[#allocation13_spill]]  ;;  %p753_p2 = scmp.ge.s32.totalorder %s1071_s22, 2 }
 0x1b2   : > { %p749_p4 = pnand %p753_p2, %p1249_p1 }
 0x1b4   : > { %p750_p7 = pneg %p749_p4 }
 0x1b6   : > { %s590_s7 = sand.u32 1, %s1489_s4  }
 0x1b7   : > { %s591_s8 = scalar_lea.sflag [#allocation5], %s590_s7 }
 0x1b8   : > { %1026 = dma.done.wait (%p750_p7), %s591_s8, 128  }
 0x1b9   : > { %1028 = vsyncadd (%p750_p7), %s591_s8, 4294967168  ;;  %s22_s22 = sadd.s32 1, %s1071_s22   ;;  %s1491_s24 = sld [smem:[#allocation18_spill]] }
 0x1ba   : > { %p19_p10 = scmp.ge.s32.totalorder %s22_s22, 6   ;;  %s1492_s26 = sld [smem:[#allocation14_spill]] }
 0x1bb   : > { %s1493_s17 = sld [smem:[#allocation19_spill]]  ;;  %s1497_s12 = smov %s1035_s13 }
 0x1bc   : > { %s1494_s19 = sld [smem:[#allocation15_spill]]  ;;  %s1498_s13 = smov %s1039_s14 }
 0x1bd   : > { %s1495_s6 = sld [smem:[#allocation16_spill]]  ;;  %s1500_s15 = smov %s1047_s16 }
 0x1be   : > { %s1496_s21 = sld [smem:[#allocation17_spill]]  ;;  %s1502_s18 = smov %s1063_s20 }
 0x1bf   : > { %s1499_s14 = smov %s1491_s24  ;;  %21 = sbr.rel (!%p19_p10) target bundleno = 14 (0xe), region = 113 }
 0x1c0   : > { %s1501_s16 = smov %s1492_s26 }
 0x1c3   : > { %s1503_s20 = smov %s1495_s6 }
 0x1c4   :  { %597 = vsyncpa [#allocation4], 1 }
 0x1c5   :  { %599 = vsyncpa [#allocation4 + $0x1], 1 }
 0x1c6   :  { %600 = vsyncpa [#allocation7], 1 }
 0x1c7   :  { %602 = vsyncpa [#allocation7 + $0x1], 1 }
 0x1c8   :  { %603 = vsyncpa [#allocation5], 1 }
 0x1c9   :  { %605 = vsyncpa [#allocation5 + $0x1], 1 }

</bundles_post_ra>
